<compile_context>
chip_gen: v7x
topology: tpu7x:2x2x1
jax: 0.10.0
libtpu: 0.0.40
codegen_flags: <defaults>
</compile_context>

<pallas_src>
import functools

import jax
import jax.numpy as jnp
from jax.experimental import pallas as pl
from jax.experimental.pallas import tpu as pltpu


def mlp_kernel(slab_ref, x_ref, o_ref, *, F, W):
    # ---- unpack weights/biases from the packed slab (static slices) ----
    w1 = slab_ref[0:32, 0:F]            # (32, F)
    w2 = slab_ref[32:48, 0:32]          # (16, 32)
    w3 = slab_ref[48:56, 0:16]          # (8, 16)
    b1 = slab_ref[0:32, W:W + 1]        # (32, 1)
    b2 = slab_ref[0:16, W + 1:W + 2]    # (16, 1)
    b3 = slab_ref[0:8,  W + 2:W + 3]    # (8, 1)
    w4 = slab_ref[0:8,  W + 3:W + 4]    # (8, 1)   last-layer weight as a column
    b4 = slab_ref[0:1,  W + 4:W + 5]    # (1, 1)

    x = x_ref[...]                      # (tb, F)  batch on sublanes

    # Layer 1: fold the transpose into the matmul — contract F on BOTH operands,
    # result is (32, tb) with the batch on lanes (lane-dense from here on).
    h = jax.lax.dot_general(w1, x, (((1,), (1,)), ((), ())),
                            preferred_element_type=jnp.float32)     # (32, tb)
    h = jnp.maximum(h + b1, 0.0)
    # Layer 2: (16,32) @ (32,tb)
    h = jnp.maximum(jnp.dot(w2, h, preferred_element_type=jnp.float32) + b2, 0.0)
    # Layer 3: (8,16) @ (16,tb)
    h = jnp.maximum(jnp.dot(w3, h, preferred_element_type=jnp.float32) + b3, 0.0)
    # Layer 4 (8 -> 1): VPU broadcast-mul + XLU sublane reduce (no padded MXU pass).
    z = jnp.sum(h * w4, axis=0, keepdims=True) + b4                 # (1, tb)
    # Lane-dense, full-width store; Pallas masks OOB lanes of the last partial tile.
    o_ref[...] = jax.nn.sigmoid(z)


def init_params(key, features):
    """PyTorch nn.Linear default init (uniform +/-1/sqrt(fan_in)), (out, in) layout."""
    dims = [features, 32, 16, 8, 1]
    params = []
    for i in range(4):
        fan_in, fan_out = dims[i], dims[i + 1]
        key, kw, kb = jax.random.split(key, 3)
        bound = 1.0 / (fan_in ** 0.5)
        w = jax.random.uniform(kw, (fan_out, fan_in), jnp.float32, -bound, bound)
        b = jax.random.uniform(kb, (fan_out,), jnp.float32, -bound, bound)
        params.append((w, b))
    return params


def pack_params(params):
    """Pack all weights/biases into one f32 slab (rows multiple of 8, cols of 128).

    Layout (W = max(F, 32)):
      rows [ 0:32], cols [0:F]   : w1 (32, F)
      rows [32:48], cols [0:32]  : w2 (16, 32)
      rows [48:56], cols [0:16]  : w3 (8, 16)
      col W   rows [0:32]        : b1      col W+1 rows [0:16] : b2
      col W+2 rows [0:8]         : b3      col W+3 rows [0:8]  : w4 (as column)
      col W+4 row 0              : b4
    """
    (w1, b1), (w2, b2), (w3, b3), (w4, b4) = params
    F = w1.shape[1]
    W = max(F, 32)
    n_cols = -(-(W + 5) // 128) * 128
    slab = jnp.zeros((56, n_cols), jnp.float32)
    slab = slab.at[0:32, 0:F].set(w1.astype(jnp.float32))
    slab = slab.at[32:48, 0:32].set(w2.astype(jnp.float32))
    slab = slab.at[48:56, 0:16].set(w3.astype(jnp.float32))
    slab = slab.at[0:32, W].set(b1.astype(jnp.float32))
    slab = slab.at[0:16, W + 1].set(b2.astype(jnp.float32))
    slab = slab.at[0:8, W + 2].set(b3.astype(jnp.float32))
    slab = slab.at[0:8, W + 3].set(w4.reshape(-1).astype(jnp.float32))
    slab = slab.at[0, W + 4].set(b4.reshape(())[()].astype(jnp.float32))
    return slab


@functools.partial(jax.jit, static_argnames=("tb",))
def net_forward(x, slab, tb=4096):
    assert tb % 256 == 0, "tb must be a multiple of 256"
    x = x.astype(jnp.float32)
    B, F = x.shape
    W = max(F, 32)

    # No padding: Pallas handles the partial last block (input tail rows are
    # undefined but never mix across lanes; output tail lanes are masked on store).
    num_tiles = pl.cdiv(B, tb)

    kernel = functools.partial(mlp_kernel, F=F, W=W)
    out = pl.pallas_call(
        kernel,
        out_shape=jax.ShapeDtypeStruct((1, B), jnp.float32),
        grid_spec=pltpu.PrefetchScalarGridSpec(
            num_scalar_prefetch=0,
            grid=(num_tiles,),
            in_specs=[
                # Whole-array slab, same block every step (DMA'd once, reused).
                pl.BlockSpec(slab.shape, lambda i: (0, 0)),
                # x tile over the batch; last dim equals full F (no 128 constraint).
                pl.BlockSpec((tb, F), lambda i: (i, 0)),
            ],
            out_specs=pl.BlockSpec((1, tb), lambda i: (0, i)),
        ),
        compiler_params=pltpu.CompilerParams(
            dimension_semantics=("parallel",)),
    )(slab, x)

    # Back to the PyTorch-style (B, 1) output.
    return out[0].reshape(B, 1)


def net_reference(x, params):
    (w1, b1), (w2, b2), (w3, b3), (w4, b4) = params
    hp = jax.lax.Precision.HIGHEST
    h = jnp.maximum(jnp.dot(x, w1.T, precision=hp) + b1, 0.0)
    h = jnp.maximum(jnp.dot(h, w2.T, precision=hp) + b2, 0.0)
    h = jnp.maximum(jnp.dot(h, w3.T, precision=hp) + b3, 0.0)
    return jax.nn.sigmoid(jnp.dot(h, w4.T, precision=hp) + b4)


if __name__ == "__main__":
    key = jax.random.PRNGKey(0)
    k_x, k_p = jax.random.split(key)

    features = 16
    batch = 2500   # ragged vs tb=1024: exercises the masked partial last tile

    x = jax.random.normal(k_x, (batch, features), dtype=jnp.float32)
    params = init_params(k_p, features)
    slab = pack_params(params)

    out = net_forward(x, slab, tb=1024)
    out = jax.block_until_ready(out)

    ref = net_reference(x, params)
    assert out.shape == (batch, 1), out.shape
    # f32 kernel vs f32 HIGHEST-precision XLA reference (torch module is f64 — not
    # representable on TPU); tolerance covers MXU vs XLA f32 pass differences.
    assert jnp.allclose(out, ref, atol=1e-3, rtol=1e-3)

    print("KERNEL_OK")
</pallas_src>

<mosaic_0001>
module attributes {stable_mosaic.version = 11 : i64} {
  func.func @mlp_kernel(%arg0: i32, %arg1: memref<56x128xf32, #tpu.memory_space<vmem>>, %arg2: memref<1024x16xf32, #tpu.memory_space<vmem>>, %arg3: memref<1x1024xf32, #tpu.memory_space<vmem>>) attributes {dimension_semantics = [#tpu.dimension_semantics<parallel>], iteration_bounds = array<i64: 3>, scalar_prefetch = 0 : i64, scratch_operands = 0 : i64, tpu.core_type = #tpu.core_type<tc>, window_params = [{pipeline_mode = #tpu.pipeline_mode<synchronous>, transform_indices = @transform_0, window_bounds = array<i64: 56, 128>}, {transform_indices = @transform_1, window_bounds = array<i64: 1024, 16>}, {transform_indices = @transform_2, window_bounds = array<i64: 1, 1024>}]} {
    %c0 = arith.constant 0 : index
    %c0_0 = arith.constant 0 : index
    %0 = vector.load %arg1[%c0, %c0_0] : memref<56x128xf32, #tpu.memory_space<vmem>>, vector<32x16xf32>
    %c32 = arith.constant 32 : index
    %c0_1 = arith.constant 0 : index
    %1 = vector.load %arg1[%c32, %c0_1] : memref<56x128xf32, #tpu.memory_space<vmem>>, vector<16x32xf32>
    %c48 = arith.constant 48 : index
    %c0_2 = arith.constant 0 : index
    %2 = vector.load %arg1[%c48, %c0_2] : memref<56x128xf32, #tpu.memory_space<vmem>>, vector<8x16xf32>
    %c0_3 = arith.constant 0 : index
    %c32_4 = arith.constant 32 : index
    %3 = vector.load %arg1[%c0_3, %c32_4] : memref<56x128xf32, #tpu.memory_space<vmem>>, vector<32x1xf32>
    %c0_5 = arith.constant 0 : index
    %c33 = arith.constant 33 : index
    %4 = vector.load %arg1[%c0_5, %c33] : memref<56x128xf32, #tpu.memory_space<vmem>>, vector<16x1xf32>
    %c0_6 = arith.constant 0 : index
    %c34 = arith.constant 34 : index
    %5 = vector.load %arg1[%c0_6, %c34] : memref<56x128xf32, #tpu.memory_space<vmem>>, vector<8x1xf32>
    %c0_7 = arith.constant 0 : index
    %c35 = arith.constant 35 : index
    %6 = vector.load %arg1[%c0_7, %c35] : memref<56x128xf32, #tpu.memory_space<vmem>>, vector<8x1xf32>
    %c0_8 = arith.constant 0 : index
    %c36 = arith.constant 36 : index
    %7 = vector.load %arg1[%c0_8, %c36] : memref<56x128xf32, #tpu.memory_space<vmem>>, vector<1x1xf32>
    %c0_9 = arith.constant 0 : index
    %c0_10 = arith.constant 0 : index
    %8 = vector.load %arg2[%c0_9, %c0_10] : memref<1024x16xf32, #tpu.memory_space<vmem>>, vector<1024x16xf32>
    %cst = arith.constant dense<0.000000e+00> : vector<32x1024xf32>
    %9 = tpu.matmul %0, %8, %cst {dimension_numbers = #tpu.dot_dimension_numbers<[1], [1], [0], [0], [0, 0, 1, 0], [], []>} : vector<32x16xf32>, vector<1024x16xf32>, vector<32x1024xf32> -> vector<32x1024xf32>
    %10 = vector.broadcast %3 : vector<32x1xf32> to vector<32x1024xf32>
    %11 = arith.addf %9, %10 : vector<32x1024xf32>
    %cst_11 = arith.constant 0.000000e+00 : f32
    %12 = vector.broadcast %cst_11 : f32 to vector<32x1024xf32>
    %13 = arith.maximumf %11, %12 : vector<32x1024xf32>
    %cst_12 = arith.constant dense<0.000000e+00> : vector<16x1024xf32>
    %14 = tpu.matmul %1, %13, %cst_12 {dimension_numbers = #tpu.dot_dimension_numbers<[1], [0], [0], [1], [0, 0, 1, 1], [], []>} : vector<16x32xf32>, vector<32x1024xf32>, vector<16x1024xf32> -> vector<16x1024xf32>
    %15 = vector.broadcast %4 : vector<16x1xf32> to vector<16x1024xf32>
    %16 = arith.addf %14, %15 : vector<16x1024xf32>
    %cst_13 = arith.constant 0.000000e+00 : f32
    %17 = vector.broadcast %cst_13 : f32 to vector<16x1024xf32>
    %18 = arith.maximumf %16, %17 : vector<16x1024xf32>
    %cst_14 = arith.constant dense<0.000000e+00> : vector<8x1024xf32>
    %19 = tpu.matmul %2, %18, %cst_14 {dimension_numbers = #tpu.dot_dimension_numbers<[1], [0], [0], [1], [0, 0, 1, 1], [], []>} : vector<8x16xf32>, vector<16x1024xf32>, vector<8x1024xf32> -> vector<8x1024xf32>
    %20 = vector.broadcast %5 : vector<8x1xf32> to vector<8x1024xf32>
    %21 = arith.addf %19, %20 : vector<8x1024xf32>
    %cst_15 = arith.constant 0.000000e+00 : f32
    %22 = vector.broadcast %cst_15 : f32 to vector<8x1024xf32>
    %23 = arith.maximumf %21, %22 : vector<8x1024xf32>
    %24 = vector.broadcast %6 : vector<8x1xf32> to vector<8x1024xf32>
    %25 = arith.mulf %23, %24 : vector<8x1024xf32>
    %cst_16 = arith.constant dense<0.000000e+00> : vector<1024xf32>
    %26 = vector.multi_reduction <add>, %25, %cst_16 [0] : vector<8x1024xf32> to vector<1024xf32>
    %27 = vector.shape_cast %26 : vector<1024xf32> to vector<1x1024xf32>
    %28 = vector.broadcast %7 : vector<1x1xf32> to vector<1x1024xf32>
    %29 = arith.addf %27, %28 : vector<1x1024xf32>
    %30 = arith.negf %29 : vector<1x1024xf32>
    %31 = math.exp %30 : vector<1x1024xf32>
    %cst_17 = arith.constant 1.000000e+00 : f32
    %32 = vector.broadcast %cst_17 : f32 to vector<1x1024xf32>
    %33 = arith.addf %32, %31 : vector<1x1024xf32>
    %34 = arith.divf %32, %33 : vector<1x1024xf32>
    %c0_18 = arith.constant 0 : index
    %c0_19 = arith.constant 0 : index
    %35 = vector.load %arg3[%c0_18, %c0_19] : memref<1x1024xf32, #tpu.memory_space<vmem>>, vector<1x1024xf32>
    tpu.vector_store %arg3[%c0_18, %c0_19], %34 {strides = array<i32>} : memref<1x1024xf32, #tpu.memory_space<vmem>>, vector<1x1024xf32>,
    return
  }
  func.func @transform_0(%arg0: i32) -> (i32, i32) {
    %c0_i32 = arith.constant 0 : i32
    %c0_i32_0 = arith.constant 0 : i32
    %c0_i32_1 = arith.constant 0 : i32
    return %c0_i32, %c0_i32_0 : i32, i32
  }
  func.func @transform_1(%arg0: i32) -> (i32, i32) {
    %c0_i32 = arith.constant 0 : i32
    %c0_i32_0 = arith.constant 0 : i32
    return %arg0, %c0_i32 : i32, i32
  }
  func.func @transform_2(%arg0: i32) -> (i32, i32) {
    %c0_i32 = arith.constant 0 : i32
    %c0_i32_0 = arith.constant 0 : i32
    return %c0_i32, %arg0 : i32, i32
  }
}

</mosaic_0001>

<bundles_post_ra>
// kernel: net_forward.1
= control target key start
LH: loop header
LB: loop body
LE: loop exit
PB: predicated region body
PF: predicated region fallthrough
CT: control target
= control target key end

     0   :  { %7 = vsyncpa [#allocation3], 0  ;;  %s3360_s0 = inlined_call_operand.vmem [shape: f32[56,128], index: 0, kind: input, shape index: {}]   ;;  %s3361_s1 = inlined_call_operand.vmem [shape: f32[2500,16], index: 1, kind: input, shape index: {}]   ;;  %s3362_s2 = inlined_call_operand.hbm [shape: f32[1,2500], index: 2, kind: output, shape index: {}]  }
   0x1   :  { %9 = vsyncpa [#allocation3 + $0x1], 0  ;;  %s2754_s9 = smov 0   ;;  %s2756_s10 = smov 0  }
   0x2   :  { %s2758_s11 = smov 0   ;;  %s2760_s12 = smov 0  }
   0x3 LB: > { %s2775_s13 = sadd.s32 4294967295, %s2729_s12   ;;  %s2003_s14 = sadd.s32 4294967294, %s2729_s12   ;;  %s2729_s12 = sphi %s2760_s12, %s3370_s12   ;;  %s2725_s11 = sphi %s2758_s11, %s3369_s11   ;;  %s2721_s10 = sphi %s2756_s10, %s3368_s10   ;;  %s2717_s9 = sphi %s2754_s9, %s3367_s9  }
   0x4   : > { %s2779_s15 = sadd.s32 1, %s2729_s12   ;;  %s69_s16 = sadd.s32 1, %s2725_s11 }
   0x5   : > { %s66_s17 = ssub.s32 %s2729_s12, %s2779_s15  ;;  %p79_p0 = scmp.ne.s32.totalorder %s2725_s11, %s2721_s10 }
   0x6   : > { %p67_p1 = scmp.eq.s32.totalorder %s66_s17, 0  ;;  %p80_p2 = scmp.eq.s32.totalorder %s2775_s13, 2 }
   0x7   : > { %p85_p3 = scmp.ne.s32.totalorder %s2721_s10, %s2717_s9  ;;  %p86_p4 = scmp.eq.s32.totalorder %s2003_s14, 2 }
   0x8   : > { %s2790_s18 = scalar_select %p67_p1, %s2725_s11, %s69_s16  }
   0x9   : > { %p2792_p5 = por %p80_p2, %p79_p0  ;;  %p2796_p6 = por %p86_p4, %p85_p3 }
   0xa   : > { %p2006_p7 = scmp.ge.s32.totalorder %s2729_s12, 1  ;;  %p124_p8 = scmp.lt.s32.totalorder %s2729_s12, 4 }
   0xc   : > { %p125_p9 = pnand %p2006_p7, %p124_p8 }
   0xd   : > { %s2803_s21 = sshll.u32 (!%p125_p9), %s2775_s13, 7  ;;  %vm325_vm0 = vcmask (!%p125_p9), 130048   ;;  %v2808_v0 = vld [vmem:[%s3360_s0] sm:$0xff] (!%p125_p9)  ;;  %v2878_v43 = vld [vmem:[%s3360_s0 + $0x10] sm:$0xff] (!%p125_p9)  ;;  %v2731_v44 = vmov (!%p125_p9), 32   ;;  %v2887_v46 = vld [vmem:[%s3360_s0 + $0x8] sm:$0xff] (!%p125_p9) }
   0xe   : > { %128 = sbr.rel (%p125_p9) target bundleno = 918 (0x396), region = 28  ;;  %p155_p10 = scmp.lt.s32.totalorder (!%p125_p9), %s2803_s21, 312  ;;  %2214 = vmatprep.mubr.msk.f32.mxu0 (!%p125_p9), %vm325_vm0, %v2808_v0  ;;  %2254 = vmatprep.mubr.msk.f32.mxu1 (!%p125_p9), %vm325_vm0, %v2808_v0  ;;  %vm2823_vm1 = vmpackc.low (!%p125_p9), %vm325_vm0, %vm325_vm0  ;;  %v2892_v47 = vld [vmem:[%s3360_s0 + $0x18] sm:$0xff] (!%p125_p9)  ;;  %v2732_v1 = vmov (!%p125_p9), 0.0   ;;  %vm1114_vm2 = vcmask (!%p125_p9), 261120  }
   0xf   : > { %2627 = vset.pattern.permute.xlu0 (!%p125_p9), %v2731_v44  ;;  %2628 = vset.pattern.permute.xlu1 (!%p125_p9), %v2731_v44 }
  0x10   : > { %307 = vperm.xlu0 (!%p125_p9), %2627, %v2808_v0   ;;  %317 = vperm.xlu1 (!%p125_p9), %2628, %v2878_v43  }
  0x14   : > { %312 = vperm.xlu0 (!%p125_p9), %2627, %v2887_v46   ;;  %322 = vperm.xlu1 (!%p125_p9), %2628, %v2892_v47  }
  0x15   : > { %s156_s24 = scalar_select %p155_p10, %s2803_s21, 312 }
  0x16   : > { %s2175_s29 = sshll.u32 (%p2792_p5), %s2775_s13, 3 }
  0x17   : > { %s2009_s25 = sshll.u32 %s156_s24, 3  ;;  %s1933_s30 = ssub.s32 (%p2792_p5), 20, %s2175_s29 }
  0x18   : > { %s2819_s28 = scalar_lea.vmem %s3361_s1, %s2009_s25  ;;  %s147_s25 = sand.u32 1, %s2721_s10  }
  0x19   : > { %v193_v2 = vld [vmem:[%s2819_s28 + $0x80] sm:$0xff]  ;;  %v194_v3 = vld [vmem:[%s2819_s28 + $0x88] sm:$0xff]  ;;  %v195_v13 = vld [vmem:[%s2819_s28 + $0x90] sm:$0xff]  ;;  %s2007_s26 = sshll.u32 %s147_s25, 3  ;;  %p1934_p11 = scmp.lt.s32.totalorder (%p2792_p5), %s1933_s30, 8 }
  0x1a   : > { %v225_v4 = vld [vmem:[%s2819_s28 + $0x180] sm:$0xff]  ;;  %v2342_v5 = vpack.c.bf16 %v194_v3, %v193_v2  ;;  %v226_v6 = vld [vmem:[%s2819_s28 + $0x188] sm:$0xff]  ;;  %v196_v15 = vld [vmem:[%s2819_s28 + $0x98] sm:$0xff]  ;;  %s149_s27 = scalar_lea.vmem [#allocation2], %s2007_s26 }
  0x1b   : > { %v177_v7 = vld [vmem:[%s2819_s28] sm:$0xff]  ;;  %v178_v8 = vld [vmem:[%s2819_s28 + $0x8] sm:$0xff]  ;;  %v2390_v9 = vpack.c.bf16 %v226_v6, %v225_v4  ;;  %v227_v16 = vld [vmem:[%s2819_s28 + $0x190] sm:$0xff]  ;;  %v2348_v18 = vpack.c.bf16 %v196_v15, %v195_v13 }
  0x1c   : > { %v2345_v10 = vpack.c.bf16 %v178_v8, %v177_v7  ;;  %v209_v11 = vld [vmem:[%s2819_s28 + $0x100] sm:$0xff]  ;;  %v210_v12 = vld [vmem:[%s2819_s28 + $0x108] sm:$0xff]  ;;  %2344 = vmatprep.subr.msk.bf16.mxu0 %vm2823_vm1, %v2342_v5  ;;  %v228_v17 = vld [vmem:[%s2819_s28 + $0x198] sm:$0xff] }
  0x1d   : > { %v2393_v14 = vpack.c.bf16 %v210_v12, %v209_v11  ;;  %2392 = vmatprep.subr.msk.bf16.mxu1 %vm2823_vm1, %v2390_v9  ;;  %v2396_v19 = vpack.c.bf16 %v228_v17, %v227_v16  ;;  %v179_v20 = vld [vmem:[%s2819_s28 + $0x10] sm:$0xff]  ;;  %v180_v21 = vld [vmem:[%s2819_s28 + $0x18] sm:$0xff]  ;;  %v197_v24 = vld [vmem:[%s2819_s28 + $0xa0] sm:$0xff] }
  0x1e   : > { %2347 = vmatpush3.bf16.xpose.msk.msra.mxu0 %vm2823_vm1, %v2345_v10  ;;  %v211_v22 = vld [vmem:[%s2819_s28 + $0x110] sm:$0xff]  ;;  %v212_v23 = vld [vmem:[%s2819_s28 + $0x118] sm:$0xff]  ;;  %v198_v25 = vld [vmem:[%s2819_s28 + $0xa8] sm:$0xff]  ;;  %v2351_v28 = vpack.c.bf16 %v180_v21, %v179_v20 }
  0x1f   : > { %2395 = vmatpush3.bf16.xpose.msk.msra.mxu1 %vm2823_vm1, %v2393_v14  ;;  %2350 = vmatprep.subr.msk.bf16.mxu0 %vm2823_vm1, %v2348_v18  ;;  %v229_v26 = vld [vmem:[%s2819_s28 + $0x1a0] sm:$0xff]  ;;  %v230_v27 = vld [vmem:[%s2819_s28 + $0x1a8] sm:$0xff]  ;;  %v2399_v29 = vpack.c.bf16 %v212_v23, %v211_v22  ;;  %v2354_v30 = vpack.c.bf16 %v198_v25, %v197_v24  ;;  %v199_v36 = vld [vmem:[%s2819_s28 + $0xb0] sm:$0xff] }
  0x20   : > { %2398 = vmatprep.subr.msk.bf16.mxu1 %vm2823_vm1, %v2396_v19  ;;  %v2402_v31 = vpack.c.bf16 %v230_v27, %v229_v26  ;;  %v181_v32 = vld [vmem:[%s2819_s28 + $0x20] sm:$0xff]  ;;  %v182_v33 = vld [vmem:[%s2819_s28 + $0x28] sm:$0xff]  ;;  %v200_v37 = vld [vmem:[%s2819_s28 + $0xb8] sm:$0xff] }
  0x21   : > { %v213_v34 = vld [vmem:[%s2819_s28 + $0x120] sm:$0xff]  ;;  %v214_v35 = vld [vmem:[%s2819_s28 + $0x128] sm:$0xff]  ;;  %v231_v38 = vld [vmem:[%s2819_s28 + $0x1b0] sm:$0xff]  ;;  %v2357_v40 = vpack.c.bf16 %v182_v33, %v181_v32  ;;  %v2360_v42 = vpack.c.bf16 %v200_v37, %v199_v36 }
  0x22   : > { %v232_v39 = vld [vmem:[%s2819_s28 + $0x1b8] sm:$0xff]  ;;  %v2405_v41 = vpack.c.bf16 %v214_v35, %v213_v34  ;;  %v183_v48 = vld [vmem:[%s2819_s28 + $0x30] sm:$0xff]  ;;  %v201_v52 = vld [vmem:[%s2819_s28 + $0xc0] sm:$0xff] }
  0x23   : > { %v2408_v45 = vpack.c.bf16 %v232_v39, %v231_v38  ;;  %v184_v49 = vld [vmem:[%s2819_s28 + $0x38] sm:$0xff]  ;;  %v215_v50 = vld [vmem:[%s2819_s28 + $0x130] sm:$0xff]  ;;  %v202_v53 = vld [vmem:[%s2819_s28 + $0xc8] sm:$0xff] }
  0x24   : > { %v216_v51 = vld [vmem:[%s2819_s28 + $0x138] sm:$0xff]  ;;  %v233_v54 = vld [vmem:[%s2819_s28 + $0x1c0] sm:$0xff]  ;;  %v234_v55 = vld [vmem:[%s2819_s28 + $0x1c8] sm:$0xff]  ;;  %v2363_v56 = vpack.c.bf16 %v184_v49, %v183_v48  ;;  %v2366_v58 = vpack.c.bf16 %v202_v53, %v201_v52 }
  0x25   : > { %v2411_v57 = vpack.c.bf16 %v216_v51, %v215_v50  ;;  %v2414_v59 = vpack.c.bf16 %v234_v55, %v233_v54  ;;  %v185_v60 = vld [vmem:[%s2819_s28 + $0x40] sm:$0xff]  ;;  %v186_v61 = vld [vmem:[%s2819_s28 + $0x48] sm:$0xff]  ;;  %v203_v2 = vld [vmem:[%s2819_s28 + $0xd0] sm:$0xff] }
  0x26   : > { %2353 = vmatpush3.bf16.xpose.msk.msra.mxu0 %vm2823_vm1, %v2351_v28  ;;  %v217_v62 = vld [vmem:[%s2819_s28 + $0x140] sm:$0xff]  ;;  %v218_v63 = vld [vmem:[%s2819_s28 + $0x148] sm:$0xff]  ;;  %v204_v3 = vld [vmem:[%s2819_s28 + $0xd8] sm:$0xff]  ;;  %v2369_v6 = vpack.c.bf16 %v186_v61, %v185_v60 }
  0x27   : > { %2401 = vmatpush3.bf16.xpose.msk.msra.mxu1 %vm2823_vm1, %v2399_v29  ;;  %2356 = vmatprep.subr.msk.bf16.mxu0 %vm2823_vm1, %v2354_v30  ;;  %v235_v4 = vld [vmem:[%s2819_s28 + $0x1d0] sm:$0xff]  ;;  %v236_v5 = vld [vmem:[%s2819_s28 + $0x1d8] sm:$0xff]  ;;  %v2417_v7 = vpack.c.bf16 %v218_v63, %v217_v62  ;;  %v2372_v8 = vpack.c.bf16 %v204_v3, %v203_v2  ;;  %v205_v14 = vld [vmem:[%s2819_s28 + $0xe0] sm:$0xff] }
  0x28   : > { %2404 = vmatprep.subr.msk.bf16.mxu1 %vm2823_vm1, %v2402_v31  ;;  %v2420_v9 = vpack.c.bf16 %v236_v5, %v235_v4  ;;  %v187_v10 = vld [vmem:[%s2819_s28 + $0x50] sm:$0xff]  ;;  %v188_v11 = vld [vmem:[%s2819_s28 + $0x58] sm:$0xff]  ;;  %v206_v15 = vld [vmem:[%s2819_s28 + $0xe8] sm:$0xff] }
  0x29   : > { %v219_v12 = vld [vmem:[%s2819_s28 + $0x150] sm:$0xff]  ;;  %v220_v13 = vld [vmem:[%s2819_s28 + $0x158] sm:$0xff]  ;;  %v237_v16 = vld [vmem:[%s2819_s28 + $0x1e0] sm:$0xff]  ;;  %v2375_v18 = vpack.c.bf16 %v188_v11, %v187_v10  ;;  %v2378_v20 = vpack.c.bf16 %v206_v15, %v205_v14 }
  0x2a   : > { %v238_v17 = vld [vmem:[%s2819_s28 + $0x1e8] sm:$0xff]  ;;  %v2423_v19 = vpack.c.bf16 %v220_v13, %v219_v12  ;;  %v189_v22 = vld [vmem:[%s2819_s28 + $0x60] sm:$0xff]  ;;  %v207_v26 = vld [vmem:[%s2819_s28 + $0xf0] sm:$0xff] }
  0x2b   : > { %v2426_v21 = vpack.c.bf16 %v238_v17, %v237_v16  ;;  %v190_v23 = vld [vmem:[%s2819_s28 + $0x68] sm:$0xff]  ;;  %v221_v24 = vld [vmem:[%s2819_s28 + $0x160] sm:$0xff]  ;;  %v208_v27 = vld [vmem:[%s2819_s28 + $0xf8] sm:$0xff] }
  0x2c   : > { %v222_v25 = vld [vmem:[%s2819_s28 + $0x168] sm:$0xff]  ;;  %v239_v28 = vld [vmem:[%s2819_s28 + $0x1f0] sm:$0xff]  ;;  %v240_v29 = vld [vmem:[%s2819_s28 + $0x1f8] sm:$0xff]  ;;  %v2381_v30 = vpack.c.bf16 %v190_v23, %v189_v22  ;;  %v2384_v32 = vpack.c.bf16 %v208_v27, %v207_v26 }
  0x2d   : > { %v2429_v31 = vpack.c.bf16 %v222_v25, %v221_v24  ;;  %v2432_v33 = vpack.c.bf16 %v240_v29, %v239_v28  ;;  %v191_v34 = vld [vmem:[%s2819_s28 + $0x70] sm:$0xff]  ;;  %v192_v35 = vld [vmem:[%s2819_s28 + $0x78] sm:$0xff]  ;;  %v257_v38 = vld [vmem:[%s2819_s28 + $0x280] sm:$0xff] }
  0x2e   : > { %2359 = vmatpush3.bf16.xpose.msk.msra.mxu0 %vm2823_vm1, %v2357_v40  ;;  %v223_v36 = vld [vmem:[%s2819_s28 + $0x170] sm:$0xff]  ;;  %v224_v37 = vld [vmem:[%s2819_s28 + $0x178] sm:$0xff]  ;;  %v258_v39 = vld [vmem:[%s2819_s28 + $0x288] sm:$0xff] }
  0x2f   : > { %2407 = vmatpush3.bf16.xpose.msk.msra.mxu1 %vm2823_vm1, %v2405_v41  ;;  %2362 = vmatprep.subr.msk.bf16.mxu0 %vm2823_vm1, %v2360_v42  ;;  %v289_v40 = vld [vmem:[%s2819_s28 + $0x380] sm:$0xff]  ;;  %v290_v41 = vld [vmem:[%s2819_s28 + $0x388] sm:$0xff]  ;;  %v2387_v42 = vpack.c.bf16 %v192_v35, %v191_v34  ;;  %v2435_v44 = vpack.c.bf16 %v224_v37, %v223_v36  ;;  %v259_v53 = vld [vmem:[%s2819_s28 + $0x290] sm:$0xff] }
  0x30   : > { %2410 = vmatprep.subr.msk.bf16.mxu1 %vm2823_vm1, %v2408_v45  ;;  %v2438_v45 = vpack.c.bf16 %v258_v39, %v257_v38  ;;  %v2486_v48 = vpack.c.bf16 %v290_v41, %v289_v40  ;;  %v241_v49 = vld [vmem:[%s2819_s28 + $0x200] sm:$0xff]  ;;  %v242_v50 = vld [vmem:[%s2819_s28 + $0x208] sm:$0xff]  ;;  %v260_v54 = vld [vmem:[%s2819_s28 + $0x298] sm:$0xff] }
  0x31   : > { %v273_v51 = vld [vmem:[%s2819_s28 + $0x300] sm:$0xff]  ;;  %v274_v52 = vld [vmem:[%s2819_s28 + $0x308] sm:$0xff]  ;;  %v2441_v55 = vpack.c.bf16 %v242_v50, %v241_v49  ;;  %v243_v61 = vld [vmem:[%s2819_s28 + $0x210] sm:$0xff] }
  0x32   : > { %v244_v62 = vld [vmem:[%s2819_s28 + $0x218] sm:$0xff]  ;;  %v275_v63 = vld [vmem:[%s2819_s28 + $0x310] sm:$0xff]  ;;  %v261_v3 = vld [vmem:[%s2819_s28 + $0x2a0] sm:$0xff] }
  0x33   : > { %v276_v2 = vld [vmem:[%s2819_s28 + $0x318] sm:$0xff]  ;;  %v262_v4 = vld [vmem:[%s2819_s28 + $0x2a8] sm:$0xff]  ;;  %v293_v5 = vld [vmem:[%s2819_s28 + $0x3a0] sm:$0xff] }
  0x34   : > { %v245_v11 = vld [vmem:[%s2819_s28 + $0x220] sm:$0xff]  ;;  %v246_v12 = vld [vmem:[%s2819_s28 + $0x228] sm:$0xff]  ;;  %v263_v15 = vld [vmem:[%s2819_s28 + $0x2b0] sm:$0xff] }
  0x35   : > { %v277_v13 = vld [vmem:[%s2819_s28 + $0x320] sm:$0xff]  ;;  %v278_v14 = vld [vmem:[%s2819_s28 + $0x328] sm:$0xff]  ;;  %v264_v16 = vld [vmem:[%s2819_s28 + $0x2b8] sm:$0xff] }
  0x36   : > { %2365 = vmatpush3.bf16.xpose.msk.msra.mxu0 %vm2823_vm1, %v2363_v56  ;;  %v291_v56 = vld [vmem:[%s2819_s28 + $0x390] sm:$0xff]  ;;  %v248_v24 = vld [vmem:[%s2819_s28 + $0x238] sm:$0xff]  ;;  %v265_v27 = vld [vmem:[%s2819_s28 + $0x2c0] sm:$0xff] }
  0x37   : > { %2413 = vmatpush3.bf16.xpose.msk.msra.mxu1 %vm2823_vm1, %v2411_v57  ;;  %2368 = vmatprep.subr.msk.bf16.mxu0 %vm2823_vm1, %v2366_v58  ;;  %v292_v57 = vld [vmem:[%s2819_s28 + $0x398] sm:$0xff]  ;;  %v2489_v58 = vpack.c.bf16 %v274_v52, %v273_v51  ;;  %v295_v17 = vld [vmem:[%s2819_s28 + $0x3b0] sm:$0xff]  ;;  %v266_v28 = vld [vmem:[%s2819_s28 + $0x2c8] sm:$0xff] }
  0x38   : > { %2416 = vmatprep.subr.msk.bf16.mxu1 %vm2823_vm1, %v2414_v59  ;;  %v2444_v59 = vpack.c.bf16 %v260_v54, %v259_v53  ;;  %v2492_v60 = vpack.c.bf16 %v292_v57, %v291_v56  ;;  %v247_v23 = vld [vmem:[%s2819_s28 + $0x230] sm:$0xff]  ;;  %v280_v26 = vld [vmem:[%s2819_s28 + $0x338] sm:$0xff]  ;;  %v297_v29 = vld [vmem:[%s2819_s28 + $0x3c0] sm:$0xff] }
  0x39   : > { %v279_v25 = vld [vmem:[%s2819_s28 + $0x330] sm:$0xff]  ;;  %v249_v35 = vld [vmem:[%s2819_s28 + $0x240] sm:$0xff]  ;;  %v250_v36 = vld [vmem:[%s2819_s28 + $0x248] sm:$0xff] }
  0x3a   : > { %v281_v37 = vld [vmem:[%s2819_s28 + $0x340] sm:$0xff]  ;;  %v282_v38 = vld [vmem:[%s2819_s28 + $0x348] sm:$0xff]  ;;  %v267_v39 = vld [vmem:[%s2819_s28 + $0x2d0] sm:$0xff] }
  0x3b   : > { %v268_v40 = vld [vmem:[%s2819_s28 + $0x2d8] sm:$0xff]  ;;  %v299_v41 = vld [vmem:[%s2819_s28 + $0x3d0] sm:$0xff]  ;;  %v269_v54 = vld [vmem:[%s2819_s28 + $0x2e0] sm:$0xff] }
  0x3c   : > { %v251_v50 = vld [vmem:[%s2819_s28 + $0x250] sm:$0xff]  ;;  %v252_v51 = vld [vmem:[%s2819_s28 + $0x258] sm:$0xff]  ;;  %v301_v56 = vld [vmem:[%s2819_s28 + $0x3e0] sm:$0xff] }
  0x3d   : > { %v283_v52 = vld [vmem:[%s2819_s28 + $0x350] sm:$0xff]  ;;  %v284_v53 = vld [vmem:[%s2819_s28 + $0x358] sm:$0xff]  ;;  %v302_v57 = vld [vmem:[%s2819_s28 + $0x3e8] sm:$0xff] }
  0x3e   : > { %2371 = vmatpush3.bf16.xpose.msk.msra.mxu0 %vm2823_vm1, %v2369_v6  ;;  %v294_v6 = vld [vmem:[%s2819_s28 + $0x3a8] sm:$0xff] }
  0x3f   : > { %2419 = vmatpush3.bf16.xpose.msk.msra.mxu1 %vm2823_vm1, %v2417_v7  ;;  %2374 = vmatprep.subr.msk.bf16.mxu0 %vm2823_vm1, %v2372_v8  ;;  %v2447_v7 = vpack.c.bf16 %v244_v62, %v243_v61  ;;  %v2495_v8 = vpack.c.bf16 %v276_v2, %v275_v63  ;;  %v2498_v10 = vpack.c.bf16 %v294_v6, %v293_v5  ;;  %v253_v62 = vld [vmem:[%s2819_s28 + $0x260] sm:$0xff]  ;;  %v254_v63 = vld [vmem:[%s2819_s28 + $0x268] sm:$0xff]  ;;  %v272_v5 = vld [vmem:[%s2819_s28 + $0x2f8] sm:$0xff] }
  0x40   : > { %2422 = vmatprep.subr.msk.bf16.mxu1 %vm2823_vm1, %v2420_v9  ;;  %v2450_v9 = vpack.c.bf16 %v262_v4, %v261_v3  ;;  %v2522_v61 = vpack.c.bf16 %v302_v57, %v301_v56  ;;  %v285_v2 = vld [vmem:[%s2819_s28 + $0x360] sm:$0xff]  ;;  %v286_v3 = vld [vmem:[%s2819_s28 + $0x368] sm:$0xff]  ;;  %v271_v4 = vld [vmem:[%s2819_s28 + $0x2f0] sm:$0xff] }
  0x41   : > { %v303_v6 = vld [vmem:[%s2819_s28 + $0x3f0] sm:$0xff] }
  0x46   : > { %2377 = vmatpush3.bf16.xpose.msk.msra.mxu0 %vm2823_vm1, %v2375_v18  ;;  %v296_v18 = vld [vmem:[%s2819_s28 + $0x3b8] sm:$0xff] }
  0x47   : > { %2425 = vmatpush3.bf16.xpose.msk.msra.mxu1 %vm2823_vm1, %v2423_v19  ;;  %2380 = vmatprep.subr.msk.bf16.mxu0 %vm2823_vm1, %v2378_v20  ;;  %v2453_v19 = vpack.c.bf16 %v246_v12, %v245_v11  ;;  %v2501_v20 = vpack.c.bf16 %v278_v14, %v277_v13  ;;  %v2504_v22 = vpack.c.bf16 %v296_v18, %v295_v17  ;;  %v255_v12 = vld [vmem:[%s2819_s28 + $0x270] sm:$0xff]  ;;  %v256_v13 = vld [vmem:[%s2819_s28 + $0x278] sm:$0xff]  ;;  %v2733_v18 = vmov 33  }
  0x48   : > { %2428 = vmatprep.subr.msk.bf16.mxu1 %vm2823_vm1, %v2426_v21  ;;  %v2456_v21 = vpack.c.bf16 %v264_v16, %v263_v15  ;;  %v287_v14 = vld [vmem:[%s2819_s28 + $0x370] sm:$0xff]  ;;  %v288_v15 = vld [vmem:[%s2819_s28 + $0x378] sm:$0xff]  ;;  %v2483_v16 = vpack.c.bf16 %v256_v13, %v255_v12  ;;  %2630 = vset.pattern.permute.xlu1 %v2733_v18 }
  0x49   : > { %v2531_v17 = vpack.c.bf16 %v288_v15, %v287_v14  ;;  %2629 = vset.pattern.permute.xlu0 %v2733_v18  ;;  %1111 = vperm.xlu1 %2630, %v2887_v46   ;;  %v3203_v18 = vld [vmem:[%s3360_s0 + $0x28] sm:$0xff] }
  0x4a   : > { %1107 = vperm.xlu0 %2629, %v2808_v0  }
  0x4e   : > { %2383 = vmatpush3.bf16.xpose.msk.msra.mxu0 %vm2823_vm1, %v2381_v30  ;;  %v298_v30 = vld [vmem:[%s2819_s28 + $0x3c8] sm:$0xff] }
  0x4f   : > { %2431 = vmatpush3.bf16.xpose.msk.msra.mxu1 %vm2823_vm1, %v2429_v31  ;;  %2386 = vmatprep.subr.msk.bf16.mxu0 %vm2823_vm1, %v2384_v32  ;;  %v2459_v31 = vpack.c.bf16 %v248_v24, %v247_v23  ;;  %v2507_v32 = vpack.c.bf16 %v280_v26, %v279_v25  ;;  %v2510_v34 = vpack.c.bf16 %v298_v30, %v297_v29 }
  0x50   : > { %2434 = vmatprep.subr.msk.bf16.mxu1 %vm2823_vm1, %v2432_v33  ;;  %v2462_v33 = vpack.c.bf16 %v266_v28, %v265_v27 }
  0x56   : > { %2389 = vmatpush3.bf16.xpose.msk.msra.mxu0 %vm2823_vm1, %v2387_v42  ;;  %v300_v42 = vld [vmem:[%s2819_s28 + $0x3d8] sm:$0xff] }
  0x57   : > { %2437 = vmatpush3.bf16.xpose.msk.msra.mxu1 %vm2823_vm1, %v2435_v44  ;;  %2440 = vmatprep.subr.msk.bf16.mxu0 %vm2823_vm1, %v2438_v45  ;;  %v2465_v44 = vpack.c.bf16 %v250_v36, %v249_v35  ;;  %v2513_v45 = vpack.c.bf16 %v282_v38, %v281_v37  ;;  %v2516_v49 = vpack.c.bf16 %v300_v42, %v299_v41 }
  0x58   : > { %2488 = vmatprep.subr.msk.bf16.mxu1 %vm2823_vm1, %v2486_v48  ;;  %v2468_v48 = vpack.c.bf16 %v268_v40, %v267_v39 }
  0x5d   : > { %2215 = vmatmul.mubr.msk.f32.vlgmr.msra.gmra.mrb[0].mxu0 %vm325_vm0, %v2808_v0 }
  0x5e   : > { %2255 = vmatmul.mubr.msk.f32.vlgmr.msra.gmra.mrb[0].mxu1 %vm325_vm0, %v2808_v0  ;;  %2443 = vmatpush3.bf16.xpose.msk.msra.mxu0 %vm2823_vm1, %v2441_v55  ;;  %v270_v55 = vld [vmem:[%s2819_s28 + $0x2e8] sm:$0xff] }
  0x5f   : > { %2491 = vmatpush3.bf16.xpose.msk.msra.mxu1 %vm2823_vm1, %v2489_v58  ;;  %2216 = vmatprep.mubr.msk.f32.mxu0 %vm325_vm0, %v2887_v46  ;;  %v2471_v58 = vpack.c.bf16 %v252_v51, %v251_v50 }
  0x60   : > { %2256 = vmatprep.mubr.msk.f32.mxu1 %vm325_vm0, %v2887_v46  ;;  %2446 = vmatprep.subr.msk.bf16.mxu0 %vm2823_vm1, %v2444_v59  ;;  %v2519_v59 = vpack.c.bf16 %v284_v53, %v283_v52 }
  0x61   : > { %2217 = vmatmul.mubr.msk.f32.gmra.mrb[2].mxu0 %vm325_vm0, %v2887_v46  ;;  %2494 = vmatprep.subr.msk.bf16.mxu1 %vm2823_vm1, %v2492_v60  ;;  %v2474_v60 = vpack.c.bf16 %v270_v55, %v269_v54 }
  0x62   : > { %2257 = vmatmul.mubr.msk.f32.gmra.mrb[2].mxu1 %vm325_vm0, %v2887_v46  ;;  %2218 = vmatprep.mubr.msk.f32.mxu0 %vm325_vm0, %v2878_v43 }
  0x63   : > { %2258 = vmatprep.mubr.msk.f32.mxu1 %vm325_vm0, %v2878_v43 }
  0x65   : > { %2219 = vmatmul.mubr.msk.f32.gmra.mrb[4].mxu0 %vm325_vm0, %v2878_v43 }
  0x66   : > { %2449 = vmatpush3.bf16.xpose.msk.msra.mxu0 %vm2823_vm1, %v2447_v7  ;;  %2259 = vmatmul.mubr.msk.f32.gmra.mrb[4].mxu1 %vm325_vm0, %v2878_v43  ;;  %v304_v7 = vld [vmem:[%s2819_s28 + $0x3f8] sm:$0xff]  ;;  %s3306_s28 = scalar_lea.sflag [#allocation3], %s147_s25 }
  0x67   : > { %2497 = vmatpush3.bf16.xpose.msk.msra.mxu1 %vm2823_vm1, %v2495_v8  ;;  %2452 = vmatprep.subr.msk.bf16.mxu0 %vm2823_vm1, %v2450_v9  ;;  %v2477_v8 = vpack.c.bf16 %v254_v63, %v253_v62  ;;  %v2525_v9 = vpack.c.bf16 %v286_v3, %v285_v2  ;;  %v2528_v11 = vpack.c.bf16 %v304_v7, %v303_v6 }
  0x68   : > { %2500 = vmatprep.subr.msk.bf16.mxu1 %vm2823_vm1, %v2498_v10  ;;  %2220 = vmatprep.mubr.msk.f32.mxu0 %vm325_vm0, %v2892_v47  ;;  %v2480_v10 = vpack.c.bf16 %v272_v5, %v271_v4 }
  0x69   : > { %2260 = vmatprep.mubr.msk.f32.mxu1 %vm325_vm0, %v2892_v47  ;;  %2221 = vmatmul.mubr.msk.f32.gmra.mrb[6].mxu0 %vm325_vm0, %v2892_v47 }
  0x6a   : > { %2261 = vmatmul.mubr.msk.f32.gmra.mrb[6].mxu1 %vm325_vm0, %v2892_v47  ;;  %2294 = vmatprep.mubr.msk.f32.mxu0 %vm325_vm0, %v2808_v0 }
  0x6b   : > { %2334 = vmatprep.mubr.msk.f32.mxu1 %vm325_vm0, %v2808_v0 }
  0x6e   : > { %2455 = vmatpush3.bf16.xpose.msk.msra.mxu0 %vm2823_vm1, %v2453_v19 }
  0x6f   : > { %2503 = vmatpush3.bf16.xpose.msk.msra.mxu1 %vm2823_vm1, %v2501_v20  ;;  %2458 = vmatprep.subr.msk.bf16.mxu0 %vm2823_vm1, %v2456_v21 }
  0x70   : > { %2506 = vmatprep.subr.msk.bf16.mxu1 %vm2823_vm1, %v2504_v22 }
  0x76   : > { %2461 = vmatpush3.bf16.xpose.msk.msra.mxu0 %vm2823_vm1, %v2459_v31 }
  0x77   : > { %2509 = vmatpush3.bf16.xpose.msk.msra.mxu1 %vm2823_vm1, %v2507_v32  ;;  %2464 = vmatprep.subr.msk.bf16.mxu0 %vm2823_vm1, %v2462_v33 }
  0x78   : > { %2512 = vmatprep.subr.msk.bf16.mxu1 %vm2823_vm1, %v2510_v34 }
  0x7e   : > { %2467 = vmatpush3.bf16.xpose.msk.msra.mxu0 %vm2823_vm1, %v2465_v44 }
  0x7f   : > { %2515 = vmatpush3.bf16.xpose.msk.msra.mxu1 %vm2823_vm1, %v2513_v45  ;;  %2470 = vmatprep.subr.msk.bf16.mxu0 %vm2823_vm1, %v2468_v48 }
  0x80   : > { %2518 = vmatprep.subr.msk.bf16.mxu1 %vm2823_vm1, %v2516_v49 }
  0x86   : > { %2473 = vmatpush3.bf16.xpose.msk.msra.mxu0 %vm2823_vm1, %v2471_v58 }
  0x87   : > { %2521 = vmatpush3.bf16.xpose.msk.msra.mxu1 %vm2823_vm1, %v2519_v59  ;;  %2476 = vmatprep.subr.msk.bf16.mxu0 %vm2823_vm1, %v2474_v60 }
  0x88   : > { %2524 = vmatprep.subr.msk.bf16.mxu1 %vm2823_vm1, %v2522_v61 }
  0x8e   : > { %2479 = vmatpush3.bf16.xpose.msk.msra.mxu0 %vm2823_vm1, %v2477_v8 }
  0x8f   : > { %2527 = vmatpush3.bf16.xpose.msk.msra.mxu1 %vm2823_vm1, %v2525_v9  ;;  %2482 = vmatprep.subr.msk.bf16.mxu0 %vm2823_vm1, %v2480_v10  ;;  %v3173_v27 = vpop.permute.xlu1 %317 }
  0x90   : > { %2530 = vmatprep.subr.msk.bf16.mxu1 %vm2823_vm1, %v2528_v11 }
  0x93   : > { %v3183_v56 = vpop.permute.xlu1 %322 }
  0x96   : > { %2485 = vmatpush3.bf16.xpose.msk.msra.mxu0 %vm2823_vm1, %v2483_v16 }
  0x97   : > { %2533 = vmatpush3.bf16.xpose.msk.msra.mxu1 %vm2823_vm1, %v2531_v17  ;;  %v3193_v17 = vld [vmem:[%s3360_s0 + $0x20] sm:$0xff] }
  0x9d   : > { %2295 = vmatmul.mubr.msk.f32.vlgmr.msra.gmra.mrb[8].mxu0 %vm325_vm0, %v2808_v0 }
  0x9e   : > { %2335 = vmatmul.mubr.msk.f32.vlgmr.msra.gmra.mrb[8].mxu1 %vm325_vm0, %v2808_v0  ;;  %2296 = vmatprep.mubr.msk.f32.mxu0 %vm325_vm0, %v2887_v46 }
  0x9f   : > { %2336 = vmatprep.mubr.msk.f32.mxu1 %vm325_vm0, %v2887_v46 }
  0xa1   : > { %2297 = vmatmul.mubr.msk.f32.gmra.mrb[10].mxu0 %vm325_vm0, %v2887_v46 }
  0xa2   : > { %2337 = vmatmul.mubr.msk.f32.gmra.mrb[10].mxu1 %vm325_vm0, %v2887_v46  ;;  %2298 = vmatprep.mubr.msk.f32.mxu0 %vm325_vm0, %v2878_v43 }
  0xa3   : > { %2338 = vmatprep.mubr.msk.f32.mxu1 %vm325_vm0, %v2878_v43 }
  0xa5   : > { %2299 = vmatmul.mubr.msk.f32.gmra.mrb[12].mxu0 %vm325_vm0, %v2878_v43 }
  0xa6   : > { %2339 = vmatmul.mubr.msk.f32.gmra.mrb[12].mxu1 %vm325_vm0, %v2878_v43  ;;  %2300 = vmatprep.mubr.msk.f32.mxu0 %vm325_vm0, %v2892_v47  ;;  %v3166_v43 = vpop.permute.xlu0 %307 }
  0xa7   : > { %2340 = vmatprep.mubr.msk.f32.mxu1 %vm325_vm0, %v2892_v47 }
  0xa9   : > { %2301 = vmatmul.mubr.msk.f32.gmra.mrb[14].mxu0 %vm325_vm0, %v2892_v47 }
  0xaa   : > { %2341 = vmatmul.mubr.msk.f32.gmra.mrb[14].mxu1 %vm325_vm0, %v2892_v47  ;;  %1185 = vmatprep.mubr.f32.mxu0 %v2732_v1  ;;  %v3168_v23 = vpop.permute.xlu0 %312 }
  0xab   : > { %1262 = vmatprep.mubr.f32.mxu1 %v2732_v1 }
 0x130   : > { %v784_v19 = vpop.f32.mrb[0].mxu0 }
 0x131   : > { %v873_v20 = vpop.f32.mrb[0].mxu1  ;;  %v786_v21 = vpop.f32.mrb[1].mxu0  ;;  %v785_v47 = vadd.f32 %v784_v19, %v3166_v43 }
 0x132   : > { %v875_v22 = vpop.f32.mrb[1].mxu1  ;;  %v874_v24 = vadd.f32 %v873_v20, %v3166_v43  ;;  %v787_v25 = vadd.f32 %v786_v21, %v3166_v43 }
 0x133   : > { %v876_v46 = vadd.f32 %v875_v22, %v3166_v43  ;;  %v1074_v34 = vmax.f32 %v785_v47, 0.0 }
 0x134   : > { %v790_v26 = vpop.f32.mrb[2].mxu0  ;;  %v1076_v37 = vmax.f32 %v874_v24, 0.0  ;;  %v1075_v38 = vmax.f32 %v787_v25, 0.0 }
 0x135   : > { %v791_v28 = vadd.f32 %v790_v26, %v3168_v23  ;;  %v879_v29 = vpop.f32.mrb[2].mxu1  ;;  %v792_v30 = vpop.f32.mrb[3].mxu0  ;;  %v1077_v42 = vmax.f32 %v876_v46, 0.0 }
 0x136   : > { %v880_v31 = vadd.f32 %v879_v29, %v3168_v23  ;;  %v793_v32 = vadd.f32 %v792_v30, %v3168_v23  ;;  %v881_v33 = vpop.f32.mrb[3].mxu1 }
 0x137   : > { %v1082_v35 = vmax.f32 %v791_v28, 0.0  ;;  %v882_v36 = vadd.f32 %v881_v33, %v3168_v23 }
 0x138   : > { %v1084_v39 = vmax.f32 %v880_v31, 0.0  ;;  %v1083_v40 = vmax.f32 %v793_v32, 0.0  ;;  %v796_v41 = vpop.f32.mrb[4].mxu0 }
 0x139   : > { %v2536_v44 = vpack.c.bf16 %v1082_v35, %v1074_v34  ;;  %v1085_v45 = vmax.f32 %v882_v36, 0.0  ;;  %v797_v48 = vadd.f32 %v796_v41, %v3173_v27  ;;  %v885_v49 = vpop.f32.mrb[4].mxu1  ;;  %v798_v50 = vpop.f32.mrb[5].mxu0 }
 0x13a   : > { %v2544_v51 = vpack.c.bf16 %v1084_v39, %v1076_v37  ;;  %v2534_v52 = vpack.c.bf16 %v1083_v40, %v1075_v38  ;;  %v886_v53 = vadd.f32 %v885_v49, %v3173_v27  ;;  %v799_v54 = vadd.f32 %v798_v50, %v3173_v27  ;;  %v887_v55 = vpop.f32.mrb[5].mxu1 }
 0x13b   : > { %v2542_v57 = vpack.c.bf16 %v1085_v45, %v1077_v42  ;;  %v888_v58 = vadd.f32 %v887_v55, %v3173_v27  ;;  %v1090_v60 = vmax.f32 %v797_v48, 0.0 }
 0x13c   : > { %2535 = vmatprep.subr.bf16.mxu0 %v2534_v52  ;;  %v802_v59 = vpop.f32.mrb[6].mxu0  ;;  %v1092_v2 = vmax.f32 %v886_v53, 0.0  ;;  %v1091_v3 = vmax.f32 %v799_v54, 0.0 }
 0x13d   : > { %2543 = vmatprep.subr.bf16.mxu1 %v2542_v57  ;;  %2537 = vmatpush1.bf16.msra.mxu0 %v2536_v44  ;;  %v891_v61 = vpop.f32.mrb[6].mxu1  ;;  %v804_v62 = vpop.f32.mrb[7].mxu0  ;;  %v803_v63 = vadd.f32 %v802_v59, %v3183_v56  ;;  %v1093_v7 = vmax.f32 %v888_v58, 0.0 }
 0x13e   : > { %2545 = vmatpush1.bf16.msra.mxu1 %v2544_v51  ;;  %v805_v4 = vadd.f32 %v804_v62, %v3183_v56  ;;  %v893_v5 = vpop.f32.mrb[7].mxu1  ;;  %v892_v6 = vadd.f32 %v891_v61, %v3183_v56 }
 0x13f   : > { %v894_v8 = vadd.f32 %v893_v5, %v3183_v56  ;;  %v1098_v9 = vmax.f32 %v803_v63, 0.0 }
 0x140   : > { %v1099_v10 = vmax.f32 %v805_v4, 0.0  ;;  %v1100_v11 = vmax.f32 %v892_v6, 0.0 }
 0x141   : > { %v1101_v12 = vmax.f32 %v894_v8, 0.0  ;;  %v2540_v13 = vpack.c.bf16 %v1098_v9, %v1090_v60 }
 0x142   : > { %v2538_v14 = vpack.c.bf16 %v1099_v10, %v1091_v3  ;;  %v2548_v15 = vpack.c.bf16 %v1100_v11, %v1092_v2 }
 0x143   : > { %v2546_v16 = vpack.c.bf16 %v1101_v12, %v1093_v7 }
 0x144   : > { %2539 = vmatprep.subr.bf16.mxu0 %v2538_v14  ;;  %v2735_v14 = vmov 35  }
 0x145   : > { %2547 = vmatprep.subr.bf16.mxu1 %v2546_v16  ;;  %2541 = vmatpush1.bf16.msra.mxu0 %v2540_v13  ;;  %v2736_v16 = vmov 36  }
 0x146   : > { %2549 = vmatpush1.bf16.msra.mxu1 %v2548_v15  ;;  %2632 = vset.pattern.permute.xlu0 %v2735_v14  ;;  %v176_v15 = vld [vmem:[%s3360_s0] sm:$0x1] }
 0x147   : > { %1745 = vperm.xlu0 %2632, %v2808_v0  }
 0x148   : > { %2154 = vmatmul.mubr.msk.f32.vlgmr.msra.gmra.mrb[16].mxu0 %vm1114_vm2, %v3193_v17 }
 0x149   : > { %2156 = vmatmul.mubr.msk.f32.vlgmr.msra.gmra.mrb[16].mxu1 %vm1114_vm2, %v3193_v17  ;;  %1191 = vmatprep.mubr.f32.mxu0 %v2732_v1 }
 0x14a   : > { %1268 = vmatprep.mubr.f32.mxu1 %v2732_v1 }
 0x14b   : > { %2634 = vset.pattern.permute.xlu0 %v2736_v16 }
 0x14c   : > { %2155 = vmatmul.mubr.msk.f32.gmra.mrb[18].mxu0 %vm1114_vm2, %v3203_v18 }
 0x14d   : > { %2157 = vmatmul.mubr.msk.f32.gmra.mrb[18].mxu1 %vm1114_vm2, %v3203_v18  ;;  %1339 = vmatprep.mubr.f32.mxu0 %v2732_v1 }
 0x14e   : > { %1416 = vmatprep.mubr.f32.mxu1 %v2732_v1 }
 0x170   : > { %v962_v19 = vpop.f32.mrb[8].mxu0 }
 0x171   : > { %v1051_v20 = vpop.f32.mrb[8].mxu1  ;;  %v964_v21 = vpop.f32.mrb[9].mxu0  ;;  %v963_v47 = vadd.f32 %v962_v19, %v3166_v43 }
 0x172   : > { %v1053_v22 = vpop.f32.mrb[9].mxu1  ;;  %v1052_v24 = vadd.f32 %v1051_v20, %v3166_v43  ;;  %v965_v25 = vadd.f32 %v964_v21, %v3166_v43 }
 0x173   : > { %v1054_v46 = vadd.f32 %v1053_v22, %v3166_v43  ;;  %v1078_v34 = vmax.f32 %v963_v47, 0.0  ;;  %v1112_v47 = vpop.permute.xlu1 %1111 }
 0x174   : > { %v968_v26 = vpop.f32.mrb[10].mxu0  ;;  %v1080_v37 = vmax.f32 %v1052_v24, 0.0  ;;  %v1079_v38 = vmax.f32 %v965_v25, 0.0 }
 0x175   : > { %v969_v28 = vadd.f32 %v968_v26, %v3168_v23  ;;  %v1057_v29 = vpop.f32.mrb[10].mxu1  ;;  %v970_v30 = vpop.f32.mrb[11].mxu0  ;;  %v1081_v42 = vmax.f32 %v1054_v46, 0.0 }
 0x176   : > { %v1058_v31 = vadd.f32 %v1057_v29, %v3168_v23  ;;  %v971_v32 = vadd.f32 %v970_v30, %v3168_v23  ;;  %v1059_v33 = vpop.f32.mrb[11].mxu1 }
 0x177   : > { %v1086_v35 = vmax.f32 %v969_v28, 0.0  ;;  %v1060_v36 = vadd.f32 %v1059_v33, %v3168_v23 }
 0x178   : > { %v1088_v39 = vmax.f32 %v1058_v31, 0.0  ;;  %v1087_v40 = vmax.f32 %v971_v32, 0.0  ;;  %v974_v41 = vpop.f32.mrb[12].mxu0 }
 0x179   : > { %v2552_v43 = vpack.c.bf16 %v1086_v35, %v1078_v34  ;;  %v1089_v44 = vmax.f32 %v1060_v36, 0.0  ;;  %v1063_v45 = vpop.f32.mrb[12].mxu1  ;;  %v976_v48 = vpop.f32.mrb[13].mxu0  ;;  %v975_v53 = vadd.f32 %v974_v41, %v3173_v27 }
 0x17a   : > { %v2560_v49 = vpack.c.bf16 %v1088_v39, %v1080_v37  ;;  %v2550_v50 = vpack.c.bf16 %v1087_v40, %v1079_v38  ;;  %v1065_v51 = vpop.f32.mrb[13].mxu1  ;;  %v1064_v54 = vadd.f32 %v1063_v45, %v3173_v27  ;;  %v977_v23 = vadd.f32 %v976_v48, %v3173_v27  ;;  %v175_v48 = vld [vmem:[%s3360_s0 + $0x30] sm:$0xff] }
 0x17b   : > { %v2558_v52 = vpack.c.bf16 %v1089_v44, %v1081_v42  ;;  %v1066_v57 = vadd.f32 %v1065_v51, %v3173_v27  ;;  %v1094_v2 = vmax.f32 %v975_v53, 0.0 }
 0x17c   : > { %v980_v55 = vpop.f32.mrb[14].mxu0  ;;  %2551 = vmatprep.subr.bf16.mxu0 %v2550_v50  ;;  %v1096_v5 = vmax.f32 %v1064_v54, 0.0  ;;  %v1095_v6 = vmax.f32 %v977_v23, 0.0 }
 0x17d   : > { %v981_v58 = vadd.f32 %v980_v55, %v3183_v56  ;;  %v1069_v59 = vpop.f32.mrb[14].mxu1  ;;  %2559 = vmatprep.subr.bf16.mxu1 %v2558_v52  ;;  %v982_v60 = vpop.f32.mrb[15].mxu0  ;;  %2553 = vmatpush1.bf16.msra.mxu0 %v2552_v43  ;;  %v1097_v8 = vmax.f32 %v1066_v57, 0.0 }
 0x17e   : > { %v1070_v61 = vadd.f32 %v1069_v59, %v3183_v56  ;;  %v983_v62 = vadd.f32 %v982_v60, %v3183_v56  ;;  %v1071_v63 = vpop.f32.mrb[15].mxu1  ;;  %2561 = vmatpush1.bf16.msra.mxu1 %v2560_v49 }
 0x17f   : > { %v1102_v3 = vmax.f32 %v981_v58, 0.0  ;;  %v1072_v4 = vadd.f32 %v1071_v63, %v3183_v56  ;;  %v2734_v56 = vmov 34  }
 0x180   : > { %v1104_v7 = vmax.f32 %v1070_v61, 0.0  ;;  %v1103_v27 = vmax.f32 %v983_v62, 0.0  ;;  %2631 = vset.pattern.permute.xlu1 %v2734_v56 }
 0x181   : > { %v2556_v9 = vpack.c.bf16 %v1102_v3, %v1094_v2  ;;  %v1105_v10 = vmax.f32 %v1072_v4, 0.0  ;;  %1446 = vperm.xlu1 %2631, %v2808_v0  }
 0x182   : > { %v2564_v11 = vpack.c.bf16 %v1104_v7, %v1096_v5  ;;  %v2554_v12 = vpack.c.bf16 %v1103_v27, %v1095_v6 }
 0x183   : > { %v2562_v13 = vpack.c.bf16 %v1105_v10, %v1097_v8 }
 0x184   : > { %2555 = vmatprep.subr.bf16.mxu0 %v2554_v12 }
 0x185   : > { %2563 = vmatprep.subr.bf16.mxu1 %v2562_v13  ;;  %2557 = vmatpush1.bf16.msra.mxu0 %v2556_v9 }
 0x186   : > { %2565 = vmatpush1.bf16.msra.mxu1 %v2564_v11  ;;  %2633 = vset.pattern.permute.xlu1 %v2736_v16 }
 0x187   : > { %1806 = vperm.xlu1 %2633, %v176_v15  }
 0x188   : > { %2158 = vmatmul.mubr.msk.f32.vlgmr.msra.gmra.mrb[20].mxu0 %vm1114_vm2, %v3193_v17 }
 0x189   : > { %2160 = vmatmul.mubr.msk.f32.vlgmr.msra.gmra.mrb[20].mxu1 %vm1114_vm2, %v3193_v17  ;;  %1345 = vmatprep.mubr.f32.mxu0 %v2732_v1  ;;  %v1108_v17 = vpop.permute.xlu0 %1107 }
 0x18a   : > { %1422 = vmatprep.mubr.f32.mxu1 %v2732_v1 }
 0x18c   : > { %2159 = vmatmul.mubr.msk.f32.gmra.mrb[22].mxu0 %vm1114_vm2, %v3203_v18 }
 0x18d   : > { %2161 = vmatmul.mubr.msk.f32.gmra.mrb[22].mxu1 %vm1114_vm2, %v3203_v18  ;;  %1516 = vmatprep.mubr.f32.mxu0 %v2732_v1 }
 0x18e   : > { %1587 = vmatprep.mubr.f32.mxu1 %v2732_v1 }
 0x200   : > { %v3255_v13 = vpop.permute.xlu1 %1446 }
 0x21b   : > { %v1187_v18 = vpop.f32.mrb[16].mxu0 }
 0x21c   : > { %v1264_v19 = vpop.f32.mrb[16].mxu1  ;;  %v1189_v20 = vpop.f32.mrb[17].mxu0  ;;  %v1188_v21 = vadd.f32 %v1187_v18, %v1108_v17 }
 0x21d   : > { %v1266_v22 = vpop.f32.mrb[17].mxu1  ;;  %v1190_v24 = vadd.f32 %v1189_v20, %v1108_v17  ;;  %v1265_v25 = vadd.f32 %v1264_v19, %v1108_v17  ;;  %v3259_v19 = vpop.permute.xlu0 %1745 }
 0x21e   : > { %v1267_v26 = vadd.f32 %v1266_v22, %v1108_v17  ;;  %v1429_v30 = vmax.f32 %v1188_v21, 0.0 }
 0x21f   : > { %v1193_v46 = vpop.f32.mrb[18].mxu0  ;;  %v1430_v32 = vmax.f32 %v1190_v24, 0.0  ;;  %v1431_v35 = vmax.f32 %v1265_v25, 0.0 }
 0x220   : > { %v1270_v0 = vpop.f32.mrb[18].mxu1  ;;  %v1195_v28 = vpop.f32.mrb[19].mxu0  ;;  %v1194_v29 = vadd.f32 %v1193_v46, %v1112_v47  ;;  %v1432_v37 = vmax.f32 %v1267_v26, 0.0 }
 0x221   : > { %v1196_v31 = vadd.f32 %v1195_v28, %v1112_v47  ;;  %v1272_v33 = vpop.f32.mrb[19].mxu1  ;;  %v1271_v34 = vadd.f32 %v1270_v0, %v1112_v47 }
 0x222   : > { %v1273_v36 = vadd.f32 %v1272_v33, %v1112_v47  ;;  %v1437_v38 = vmax.f32 %v1194_v29, 0.0 }
 0x223   : > { %v1438_v39 = vmax.f32 %v1196_v31, 0.0  ;;  %v1439_v40 = vmax.f32 %v1271_v34, 0.0 }
 0x224   : > { %v1440_v41 = vmax.f32 %v1273_v36, 0.0  ;;  %v2568_v42 = vpack.c.bf16 %v1437_v38, %v1429_v30 }
 0x225   : > { %v2566_v43 = vpack.c.bf16 %v1438_v39, %v1430_v32  ;;  %v2572_v44 = vpack.c.bf16 %v1439_v40, %v1431_v35 }
 0x226   : > { %v2570_v45 = vpack.c.bf16 %v1440_v41, %v1432_v37 }
 0x227   : > { %2567 = vmatprep.subr.bf16.mxu0 %v2566_v43 }
 0x228   : > { %2571 = vmatprep.subr.bf16.mxu1 %v2570_v45  ;;  %2569 = vmatpush1.bf16.msra.mxu0 %v2568_v42 }
 0x229   : > { %2573 = vmatpush1.bf16.msra.mxu1 %v2572_v44 }
 0x22b   : > { %2162 = vmatmul.mubr.msk.f32.vlgmr.msra.gmra.mrb[24].mxu0 %vm325_vm0, %v175_v48 }
 0x22c   : > { %2163 = vmatmul.mubr.msk.f32.vlgmr.msra.gmra.mrb[24].mxu1 %vm325_vm0, %v175_v48  ;;  %1658 = vmatprep.mubr.f32.mxu0 %v2732_v1 }
 0x22d   : > { %1729 = vmatprep.mubr.f32.mxu1 %v2732_v1 }
 0x25b   : > { %v1341_v49 = vpop.f32.mrb[20].mxu0 }
 0x25c   : > { %v1418_v50 = vpop.f32.mrb[20].mxu1  ;;  %v1343_v51 = vpop.f32.mrb[21].mxu0  ;;  %v1342_v53 = vadd.f32 %v1341_v49, %v1108_v17 }
 0x25d   : > { %v1420_v52 = vpop.f32.mrb[21].mxu1  ;;  %v1419_v54 = vadd.f32 %v1418_v50, %v1108_v17  ;;  %v1344_v23 = vadd.f32 %v1343_v51, %v1108_v17 }
 0x25e   : > { %v1421_v57 = vadd.f32 %v1420_v52, %v1108_v17  ;;  %v1433_v2 = vmax.f32 %v1342_v53, 0.0 }
 0x25f   : > { %v1347_v55 = vpop.f32.mrb[22].mxu0  ;;  %v1435_v5 = vmax.f32 %v1419_v54, 0.0  ;;  %v1434_v1 = vmax.f32 %v1344_v23, 0.0 }
 0x260   : > { %v1348_v58 = vadd.f32 %v1347_v55, %v1112_v47  ;;  %v1424_v59 = vpop.f32.mrb[22].mxu1  ;;  %v1349_v60 = vpop.f32.mrb[23].mxu0  ;;  %v1436_v27 = vmax.f32 %v1421_v57, 0.0 }
 0x261   : > { %v1425_v61 = vadd.f32 %v1424_v59, %v1112_v47  ;;  %v1350_v62 = vadd.f32 %v1349_v60, %v1112_v47  ;;  %v1426_v63 = vpop.f32.mrb[23].mxu1 }
 0x262   : > { %v1441_v3 = vmax.f32 %v1348_v58, 0.0  ;;  %v1427_v4 = vadd.f32 %v1426_v63, %v1112_v47 }
 0x263   : > { %v1443_v6 = vmax.f32 %v1425_v61, 0.0  ;;  %v1442_v7 = vmax.f32 %v1350_v62, 0.0 }
 0x264   : > { %v2576_v8 = vpack.c.bf16 %v1441_v3, %v1433_v2  ;;  %v1444_v9 = vmax.f32 %v1427_v4, 0.0 }
 0x265   : > { %v2580_v10 = vpack.c.bf16 %v1443_v6, %v1435_v5  ;;  %v2574_v11 = vpack.c.bf16 %v1442_v7, %v1434_v1 }
 0x266   : > { %v2578_v12 = vpack.c.bf16 %v1444_v9, %v1436_v27 }
 0x267   : > { %2575 = vmatprep.subr.bf16.mxu0 %v2574_v11 }
 0x268   : > { %2579 = vmatprep.subr.bf16.mxu1 %v2578_v12  ;;  %2577 = vmatpush1.bf16.msra.mxu0 %v2576_v8  ;;  %v2737_v8 = vmov 1966171168  }
 0x269   : > { %2581 = vmatpush1.bf16.msra.mxu1 %v2580_v10  ;;  %v1878_v9 = vunpack.c.l.s4 %v2737_v8  ;;  %v1880_v10 = vlaneseq }
 0x26b   : > { %2164 = vmatmul.mubr.msk.f32.vlgmr.msra.gmra.mrb[26].mxu0 %vm325_vm0, %v175_v48  ;;  %v1879_v11 = vunpack.c.0.s8 %v1878_v9  ;;  %v1881_v12 = vshrl.u32 %v1880_v10, 7 }
 0x26c   : > { %2165 = vmatmul.mubr.msk.f32.vlgmr.msra.gmra.mrb[26].mxu1 %vm325_vm0, %v175_v48  ;;  %v3267_v48 = vpop.permute.xlu1 %1806 }
 0x2fe   : > { %v1518_v56 = vpop.f32.mrb[24].mxu0 }
 0x2ff   : > { %v1589_v14 = vpop.f32.mrb[24].mxu1  ;;  %v1520_v15 = vpop.f32.mrb[25].mxu0  ;;  %v1519_v16 = vadd.f32 %v1518_v56, %v3255_v13 }
 0x300   : > { %v1521_v17 = vadd.f32 %v1520_v15, %v3255_v13  ;;  %v1591_v18 = vpop.f32.mrb[25].mxu1  ;;  %v1590_v20 = vadd.f32 %v1589_v14, %v3255_v13  ;;  %v3273_v14 = vsub.s32 %v1879_v11, %v1881_v12 }
 0x301   : > { %v1592_v21 = vadd.f32 %v1591_v18, %v3255_v13  ;;  %v1736_v22 = vmax.f32 %v1519_v16, 0.0 }
 0x302   : > { %v1737_v47 = vmax.f32 %v1521_v17, 0.0  ;;  %v1738_v24 = vmax.f32 %v1590_v20, 0.0 }
 0x303   : > { %v1739_v25 = vmax.f32 %v1592_v21, 0.0  ;;  %v1748_v26 = vmul.f32 %v3259_v19, %v1736_v22 }
 0x304   : > { %v1749_v46 = vmul.f32 %v3259_v19, %v1737_v47  ;;  %v1750_v0 = vmul.f32 %v3259_v19, %v1738_v24 }
 0x305   : > { %v1751_v28 = vmul.f32 %v3259_v19, %v1739_v25  ;;  %v1756_v29 = vrot.slane %v1748_v26, 4 }
 0x306   : > { %v1762_v30 = vrot.slane %v1749_v46, 4  ;;  %v1768_v31 = vrot.slane %v1750_v0, 4 }
 0x307   : > { %v1757_v32 = vadd.f32 %v1756_v29, %v1748_v26  ;;  %v1774_v33 = vrot.slane %v1751_v28, 4 }
 0x308   : > { %v1763_v34 = vadd.f32 %v1762_v30, %v1749_v46  ;;  %v1769_v35 = vadd.f32 %v1768_v31, %v1750_v0 }
 0x309   : > { %v1758_v36 = vrot.slane %v1757_v32, 2  ;;  %v1775_v37 = vadd.f32 %v1774_v33, %v1751_v28 }
 0x30a   : > { %v1764_v38 = vrot.slane %v1763_v34, 2  ;;  %v1770_v39 = vrot.slane %v1769_v35, 2 }
 0x30b   : > { %v1776_v40 = vrot.slane %v1775_v37, 2  ;;  %v1759_v41 = vadd.f32 %v1758_v36, %v1757_v32 }
 0x30c   : > { %v1765_v42 = vadd.f32 %v1764_v38, %v1763_v34  ;;  %v1771_v43 = vadd.f32 %v1770_v39, %v1769_v35 }
 0x30d   : > { %v1760_v44 = vrot.slane %v1759_v41, 1  ;;  %v1777_v45 = vadd.f32 %v1776_v40, %v1775_v37 }
 0x30e   : > { %v1766_v49 = vrot.slane %v1765_v42, 1  ;;  %v1772_v50 = vrot.slane %v1771_v43, 1 }
 0x30f   : > { %v1761_v51 = vadd.f32 %v1760_v44, %v1759_v41  ;;  %v1778_v52 = vrot.slane %v1777_v45, 1 }
 0x310   : > { %v1767_v53 = vadd.f32 %v1766_v49, %v1765_v42  ;;  %v1773_v54 = vadd.f32 %v1772_v50, %v1771_v43 }
 0x311   : > { %v1779_v23 = vadd.f32 %v1778_v52, %v1777_v45  ;;  %v1809_v55 = vadd.f32 %v3267_v48, %v1761_v51 }
 0x312   : > { %v1810_v57 = vadd.f32 %v3267_v48, %v1767_v53  ;;  %v1811_v58 = vadd.f32 %v3267_v48, %v1773_v54 }
 0x313   : > { %v1812_v59 = vadd.f32 %v3267_v48, %v1779_v23  ;;  %v2166_v60 = vmul.f32 -1.442695, %v1809_v55 }
 0x314   : > { %v2167_v61 = vmul.f32 -1.442695, %v1810_v57  ;;  %v2168_v62 = vmul.f32 -1.442695, %v1811_v58 }
 0x315   : > { %2635 = vpow2.f32 %v2166_v60  ;;  %v2169_v63 = vmul.f32 -1.442695, %v1812_v59 }
 0x316   : > { %2637 = vpow2.f32 %v2167_v61 }
 0x317   : > { %2639 = vpow2.f32 %v2168_v62 }
 0x318   : > { %2641 = vpow2.f32 %v2169_v63 }
 0x31f   : > { %v2636_v2 = vpop.eup %2635 }
 0x320   : > { %v2638_v3 = vpop.eup %2637  ;;  %v1841_v4 = vadd.f32 1.0, %v2636_v2 }
 0x321   : > { %v2640_v5 = vpop.eup %2639  ;;  %v1842_v1 = vadd.f32 1.0, %v2638_v3 }
 0x322   : > { %v2642_v6 = vpop.eup %2641  ;;  %v1843_v7 = vadd.f32 1.0, %v2640_v5  ;;  %2643 = vrcp.f32 %v1841_v4 }
 0x323   : > { %v1844_v27 = vadd.f32 1.0, %v2642_v6  ;;  %2645 = vrcp.f32 %v1842_v1 }
 0x324   : > { %2647 = vrcp.f32 %v1843_v7 }
 0x325   : > { %2649 = vrcp.f32 %v1844_v27 }
 0x32c   : > { %v2644_v56 = vpop.eup %2643 }
 0x32d   : > { %v2646_v15 = vpop.eup %2645 }
 0x32e   : > { %v2648_v16 = vpop.eup %2647  ;;  %v1873_v17 = vcombine.low %v2644_v56, %v2646_v15 }
 0x32f   : > { %v2650_v18 = vpop.eup %2649 }
 0x330   : > { %v1874_v20 = vcombine.low %v2648_v16, %v2650_v18  ;;  %v3276_v21 = vrot.slane %v1873_v17, %v3273_v14 }
 0x332   : > { %v3279_v22 = vrot.slane %v1874_v20, %v3273_v14 }
 0x334   : > { %v1905_v47 = vcombine.low %v3276_v21, %v3279_v22 }
 0x33e   : > { %v1660_v24 = vpop.f32.mrb[26].mxu0 }
 0x33f   : > { %v1661_v25 = vadd.f32 %v1660_v24, %v3255_v13  ;;  %v1731_v26 = vpop.f32.mrb[26].mxu1  ;;  %v1662_v46 = vpop.f32.mrb[27].mxu0 }
 0x340   : > { %v1732_v0 = vadd.f32 %v1731_v26, %v3255_v13  ;;  %v1663_v28 = vadd.f32 %v1662_v46, %v3255_v13  ;;  %v1733_v29 = vpop.f32.mrb[27].mxu1 }
 0x341   : > { %v1740_v30 = vmax.f32 %v1661_v25, 0.0  ;;  %v1734_v31 = vadd.f32 %v1733_v29, %v3255_v13 }
 0x342   : > { %v1742_v32 = vmax.f32 %v1732_v0, 0.0  ;;  %v1741_v33 = vmax.f32 %v1663_v28, 0.0  ;;  %v1913_v28 = vrot.slane %v1905_v47, %v3273_v14 }
 0x343   : > { %v1752_v34 = vmul.f32 %v3259_v19, %v1740_v30  ;;  %v1743_v35 = vmax.f32 %v1734_v31, 0.0 }
 0x344   : > { %v1754_v36 = vmul.f32 %v3259_v19, %v1742_v32  ;;  %v1753_v37 = vmul.f32 %v3259_v19, %v1741_v33 }
 0x345   : > { %v1780_v38 = vrot.slane %v1752_v34, 4  ;;  %v1755_v39 = vmul.f32 %v3259_v19, %v1743_v35 }
 0x346   : > { %v1792_v40 = vrot.slane %v1754_v36, 4  ;;  %v1786_v41 = vrot.slane %v1753_v37, 4 }
 0x347   : > { %v1781_v42 = vadd.f32 %v1780_v38, %v1752_v34  ;;  %v1798_v43 = vrot.slane %v1755_v39, 4 }
 0x348   : > { %v1793_v44 = vadd.f32 %v1792_v40, %v1754_v36  ;;  %v1787_v45 = vadd.f32 %v1786_v41, %v1753_v37 }
 0x349   : > { %v1782_v49 = vrot.slane %v1781_v42, 2  ;;  %v1799_v13 = vadd.f32 %v1798_v43, %v1755_v39 }
 0x34a   : > { %v1794_v50 = vrot.slane %v1793_v44, 2  ;;  %v1788_v51 = vrot.slane %v1787_v45, 2 }
 0x34b   : > { %v1783_v52 = vadd.f32 %v1782_v49, %v1781_v42  ;;  %v1800_v53 = vrot.slane %v1799_v13, 2 }
 0x34c   : > { %v1795_v54 = vadd.f32 %v1794_v50, %v1793_v44  ;;  %v1789_v23 = vadd.f32 %v1788_v51, %v1787_v45 }
 0x34d   : > { %v1784_v55 = vrot.slane %v1783_v52, 1  ;;  %v1801_v57 = vadd.f32 %v1800_v53, %v1799_v13 }
 0x34e   : > { %v1796_v58 = vrot.slane %v1795_v54, 1  ;;  %v1790_v59 = vrot.slane %v1789_v23, 1 }
 0x34f   : > { %v1785_v60 = vadd.f32 %v1784_v55, %v1783_v52  ;;  %v1802_v19 = vrot.slane %v1801_v57, 1 }
 0x350   : > { %v1797_v61 = vadd.f32 %v1796_v58, %v1795_v54  ;;  %v1791_v62 = vadd.f32 %v1790_v59, %v1789_v23 }
 0x351   : > { %v1803_v63 = vadd.f32 %v1802_v19, %v1801_v57  ;;  %v1813_v2 = vadd.f32 %v3267_v48, %v1785_v60 }
 0x352   : > { %v1814_v3 = vadd.f32 %v3267_v48, %v1791_v62  ;;  %v1815_v4 = vadd.f32 %v3267_v48, %v1797_v61 }
 0x353   : > { %v1816_v5 = vadd.f32 %v3267_v48, %v1803_v63  ;;  %v2170_v1 = vmul.f32 -1.442695, %v1813_v2 }
 0x354   : > { %v2171_v6 = vmul.f32 -1.442695, %v1814_v3  ;;  %v2172_v7 = vmul.f32 -1.442695, %v1815_v4 }
 0x355   : > { %2651 = vpow2.f32 %v2170_v1  ;;  %v2173_v27 = vmul.f32 -1.442695, %v1816_v5 }
 0x356   : > { %2653 = vpow2.f32 %v2171_v6 }
 0x357   : > { %2655 = vpow2.f32 %v2172_v7 }
 0x358   : > { %2657 = vpow2.f32 %v2173_v27 }
 0x35f   : > { %v2652_v8 = vpop.eup %2651 }
 0x360   : > { %v2654_v9 = vpop.eup %2653  ;;  %v1845_v10 = vadd.f32 1.0, %v2652_v8 }
 0x361   : > { %v2656_v11 = vpop.eup %2655  ;;  %v1846_v12 = vadd.f32 1.0, %v2654_v9 }
 0x362   : > { %v2658_v56 = vpop.eup %2657  ;;  %v1847_v15 = vadd.f32 1.0, %v2656_v11  ;;  %2659 = vrcp.f32 %v1845_v10 }
 0x363   : > { %v1848_v16 = vadd.f32 1.0, %v2658_v56  ;;  %2661 = vrcp.f32 %v1846_v12 }
 0x364   : > { %2663 = vrcp.f32 %v1847_v15 }
 0x365   : > { %2665 = vrcp.f32 %v1848_v16 }
 0x36c   : > { %v2660_v48 = vpop.eup %2659 }
 0x36d   : > { %v2662_v17 = vpop.eup %2661 }
 0x36e   : > { %v2664_v18 = vpop.eup %2663  ;;  %v1875_v20 = vcombine.low %v2660_v48, %v2662_v17 }
 0x36f   : > { %v2666_v24 = vpop.eup %2665 }
 0x370   : > { %v1876_v25 = vcombine.low %v2664_v18, %v2666_v24  ;;  %v1897_v26 = vrot.slane %v1875_v20, %v3273_v14 }
 0x372   : > { %v1904_v46 = vrot.slane %v1876_v25, %v3273_v14 }
 0x374   : > { %v1906_v0 = vcombine.low %v1897_v26, %v1904_v46  ;;  %1931 = sbr.rel (!%p2792_p5) target bundleno = 918 (0x396), region = 32 }
 0x376   : > { %v1920_v29 = vrot.slane %v1906_v0, %v3273_v14 }
 0x378   : > { %v1921_v30 = vcombine.low %v1913_v28, %v1920_v29 }
 0x37a   : > { %1923 = vst [vmem:[%s149_s27] sm:$0xff] %v1921_v30 }
 0x37b   : > { %s3372_s30 = smov (!%p1934_p11, %s1933_s30), 8 }
 0x37c   : > { %s3311_s3 = sshll.u32 %s3372_s30, 4 }
 0x37d   : > { %s1938_s4 = ssub.s32 128, %s3311_s3 }
 0x37e   : > { %1939 = vsyncadd %s3306_s28, %s1938_s4  ;;  %p2177_p12 = scmp.ne.s32.totalorder %s3311_s3, 0  ;;  %s3320_s19 = scalar_lea.hbm %s3362_s2, %s2803_s21 }
 0x37f   : > { %s1944_s7 = sshll.u32 %s149_s27, 4  ;;  %s2738_s8 = smov [#allocation2]   ;;  %s1945_s7 = int_to_ptr.vmem [resolvable:$true] %s1944_s7 }
 0x380   : > { %s2667_s13 = scalar_lea.vmem %s1945_s7, %s3311_s3  ;;  %s2671_s14 = sshll.u32 %s2738_s8, 4  ;;  %s2672_s14 = int_to_ptr.vmem [resolvable:$false] %s2671_s14 }
 0x381   : > { %p2668_p13 = scmp.ne.s32.totalorder %s1945_s7, %s2667_s13  ;;  %s2673_s16 = scalar_lea.vmem %s2672_s14, 256 }
 0x382   : > { %p2674_p2 = scmp.lt.s32.totalorder %s1945_s7, %s2672_s14  ;;  %p2675_p3 = scmp.lt.s32.totalorder %s2673_s16, %s2667_s13 }
 0x383   : > { %p2669_p0 = pnand %p2668_p13, %p2177_p12 }
 0x384   : > { %p2676_p4 = por %p2675_p3, %p2674_p2 }
 0x385   : > { %p2670_p1 = pneg %p2669_p0 }
 0x387   : > { %p2677_p5 = pnand %p2676_p4, %p2670_p1 }
 0x389   : > { %2680 = shalt.err (!%p2677_p5)
}
 0x38a   : > { %s2681_s21 = scalar_lea.hbm %s3320_s19, %s3311_s3  ;;  %s2685_s23 = scalar_lea.hbm %s3362_s2, 320 }
 0x38b   : > { %p2682_p7 = scmp.ne.s32.totalorder %s3320_s19, %s2681_s21  ;;  %p2686_p10 = scmp.lt.u32.totalorder %s3320_s19, %s3362_s2 }
 0x38c   : > { %p2687_p11 = scmp.lt.u32.totalorder %s2685_s23, %s2681_s21  ;;  %p2689_p0 = scmp.lt.u32.totalorder %s2681_s21, %s3320_s19 }
 0x38d   : > { %p2683_p8 = pnand %p2682_p7, %p2177_p12 }
 0x38e   : > { %p2688_p13 = por %p2687_p11, %p2686_p10 }
 0x38f   : > { %p2684_p9 = pneg %p2683_p8 }
 0x390   : > { %p2690_p1 = por %p2689_p0, %p2688_p13 }
 0x392   : > { %p2691_p2 = pnand %p2690_p1, %p2684_p9 }
 0x394   : > { %2694 = shalt.err (!%p2691_p2)
}
 0x395   : > { %1947 = dma.vmem_to_hbm [thread:$0]  (%p2177_p12), %s1945_s7, %s3311_s3, %s3320_s19, %s3306_s28  }
 0x396 PF: > { %p2587_p3 = scmp.ge.s32.totalorder %s2729_s12, 2  ;;  %s1956_s26 = sand.u32 1, %s2717_s9  }
 0x397   : > { %s1957_s27 = scalar_lea.sflag [#allocation3], %s1956_s26 }
 0x398   : > { %p2584_p4 = pnand %p2587_p3, %p2796_p6 }
 0x39a   : > { %2712 = dma.done.wait (!%p2584_p4), %s1957_s27, 128  }
 0x39b   : > { %2714 = vsyncadd (!%p2584_p4), %s1957_s27, 4294967168  ;;  %p12_p5 = scmp.ge.s32.totalorder %s2779_s15, 5   ;;  %s3367_s9 = smov %s2721_s10 }
 0x39c   : > { %s3368_s10 = smov %s2725_s11  ;;  %s3369_s11 = smov %s2790_s18 }
 0x39d   : > { %s3370_s12 = smov %s2779_s15  ;;  %14 = sbr.rel (!%p12_p5) target bundleno = 3 (0x3), region = 63 }
 0x3a4   :  { %1962 = vsyncpa [#allocation3], 1 }
 0x3a5   :  { %1964 = vsyncpa [#allocation3 + $0x1], 1 }

</bundles_post_ra>
